<compile_context>
chip_gen: v6e
topology: v6e:2x2x1
jax: 0.10.0
libtpu: 0.0.40
codegen_flags: <defaults>
</compile_context>

<pallas_src>
import functools

import jax
import jax.numpy as jnp
from jax import lax
from jax.experimental import pallas as pl
from jax.experimental.pallas import tpu as pltpu


def _vmem_capacity_bytes():
    """Physical VMEM per core; falls back to 64 MiB (smallest of v5e/v6e/v7x)."""
    try:
        info = pltpu.get_tpu_info()
        cap = getattr(info, "vmem_capacity_bytes", None)
        if cap:
            return int(cap)
    except Exception:
        pass
    return 64 << 20


def _vmem_limit_bytes(block_bytes, w_bytes, out_block_bytes, scratch_bytes,
                      vmem_cap):
    """Scoped-VMEM limit from actual usage (double-buffered), with headroom."""
    need = (2 * block_bytes + 2 * w_bytes + 2 * out_block_bytes
            + scratch_bytes + (4 << 20))
    return int(max(16 << 20, min(need, vmem_cap * 3 // 4)))


# --------------------------------------------------------------------------
# Streaming path: large H*W, reduce over L in lane tiles with resident
# accumulators.
# --------------------------------------------------------------------------
def _stream_kernel(x_ref, w_ref, o_ref, sum_acc, max_acc, *,
                   n_channels, n_stripes, rem, use_relu, use_mxu):
    # x_ref:   (1, CS, TL)  input tile; CS = C*S dense on the sublane axis,
    #                       TL (multiple of 128) on the lane axis.
    # w_ref:   (2C, O) f32  transposed conv weight; rows [:C] already carry the
    #                       mean's 1/L (kernel only accumulates a plain sum).
    # o_ref:   (1, S, O)    output block (O on the lane axis -> unmasked vst).
    # sum_acc: (CS, 1) f32  running sum over L.
    # max_acc: (CS, 1) f32  running max over L (f32: dtype-safe -inf init, no
    #                       per-step bf16 pack/unpack of the carry on v5e).
    c = n_channels
    s = n_stripes
    k = pl.program_id(1)
    k_last = pl.num_programs(1) - 1

    @pl.when(k == 0)
    def _init():
        sum_acc[...] = jnp.zeros(sum_acc.shape, jnp.float32)
        max_acc[...] = jnp.full(max_acc.shape, -jnp.inf, jnp.float32)

    # Single load feeds BOTH reductions (one traversal of the tile).
    blk = x_ref[0]                                            # (CS, TL)

    def _accumulate(vals_for_sum, vals_for_max):
        sum_acc[...] += jnp.sum(vals_for_sum, axis=-1, keepdims=True,
                                dtype=jnp.float32)
        max_acc[...] = jnp.maximum(
            max_acc[...],
            jnp.max(vals_for_max, axis=-1, keepdims=True).astype(jnp.float32))

    if rem == 0:
        _accumulate(blk, blk)
    else:
        # Ragged L: only the last tile pays for the lane mask; full tiles stay
        # on the plain accumulate path.
        @pl.when(k < k_last)
        def _full_tile():
            _accumulate(blk, blk)

        @pl.when(k == k_last)
        def _ragged_tile():
            lane = lax.broadcasted_iota(jnp.int32, blk.shape, 1)
            valid = lane < rem
            fill_max = jnp.full(blk.shape, jnp.finfo(blk.dtype).min, blk.dtype)
            _accumulate(jnp.where(valid, blk, jnp.zeros_like(blk)),
                        jnp.where(valid, blk, fill_max))

    @pl.when(k == k_last)
    def _finalize():
        w = w_ref[...]                                        # (2C, O) f32
        o_dim = w.shape[1]
        if use_mxu:
            sum_v = sum_acc[...].reshape(c, s)                # (C, S)
            max_v = max_acc[...].reshape(c, s)                # (C, S)
            cat = jnp.concatenate([sum_v, max_v], axis=0)     # (2C, S)
            # lhs-transposed matmul: contract dim 0 of cat with dim 0 of w,
            # result (S, O) keeps O on the lane axis for a dense store.
            out = lax.dot_general(cat, w, (((0,), (0,)), ((), ())),
                                  preferred_element_type=jnp.float32)
        else:
            # Tiny C/O: a few VPU FMAs; slicing the (CS, 1) accumulators gives
            # the (S, 1) stripe columns directly (no transposes / reshapes).
            out = jnp.zeros((s, o_dim), jnp.float32)
            for ci in range(c):
                out = out + sum_acc[ci * s:(ci + 1) * s, :] * w[ci:ci + 1, :]
                out = out + max_acc[ci * s:(ci + 1) * s, :] * w[c + ci:c + ci + 1, :]
        if use_relu:
            out = jnp.maximum(out, 0.0)
        o_ref[0] = out.astype(o_ref.dtype)


# --------------------------------------------------------------------------
# Batched path: whole L fits one tile; tile over N so each grid step still
# moves a sizable DMA.  No accumulators / init / finalize phases needed.
# --------------------------------------------------------------------------
def _batched_kernel(x_ref, w_ref, o_ref, *, n_channels, n_stripes, use_relu):
    # x_ref: (TN, CS, L); w_ref: (2C, O) f32; o_ref: (TN, S, O)
    c = n_channels
    s = n_stripes
    tn = x_ref.shape[0]
    o_dim = w_ref.shape[1]

    blk = x_ref[...]                                          # (TN, CS, L)
    sum_v = jnp.sum(blk, axis=-1, dtype=jnp.float32)          # (TN, CS)
    max_v = jnp.max(blk, axis=-1).astype(jnp.float32)         # (TN, CS)
    w = w_ref[...]

    if s == 1:
        cat = jnp.concatenate([sum_v, max_v], axis=-1)        # (TN, 2C)
        out = jnp.dot(cat, w, preferred_element_type=jnp.float32)   # (TN, O)
        out = out.reshape(tn, 1, o_dim)
    else:
        # (TN, C, S) -> (TN, S, C) -> (TN*S, C); one 2-D matmul over 2C.
        sum_t = jnp.transpose(sum_v.reshape(tn, c, s), (0, 2, 1)).reshape(tn * s, c)
        max_t = jnp.transpose(max_v.reshape(tn, c, s), (0, 2, 1)).reshape(tn * s, c)
        cat = jnp.concatenate([sum_t, max_t], axis=-1)        # (TN*S, 2C)
        out = jnp.dot(cat, w, preferred_element_type=jnp.float32)   # (TN*S, O)
        out = out.reshape(tn, s, o_dim)

    if use_relu:
        out = jnp.maximum(out, 0.0)
    o_ref[...] = out.astype(o_ref.dtype)


# --------------------------------------------------------------------------
# Wrapper
# --------------------------------------------------------------------------
def max_avg_plus(x_nchw, conv_weight, *, num_stripes=1, use_relu=False,
                 block_budget_bytes=None):
    """x_nchw: (N, C, H, W); conv_weight: (O, 2C, 1, 1).  Returns (N, O, S, 1)."""
    N, C, H, W = x_nchw.shape
    O = conv_weight.shape[0]
    assert conv_weight.shape == (O, 2 * C, 1, 1)
    assert jnp.issubdtype(x_nchw.dtype, jnp.floating), "float inputs only"
    S = num_stripes
    # TODO(synk): support PyTorch's uneven adaptive-pool bins when H % S != 0.
    assert H % S == 0
    L = (H // S) * W
    CS = C * S

    # Free reshape (pure metadata): NCHW -> (N, C*S, L).  Channel-stripes are
    # dense on the sublane axis, image pixels on the lane axis.
    x_k = x_nchw.reshape(N, CS, L)

    # Transposed 1x1 conv weight (2C, O); fold the mean's 1/L into the avg rows
    # (note: sum-then-scale, not bit-identical to mean-then-matmul).
    w = conv_weight[:, :, 0, 0].astype(jnp.float32)                       # (O, 2C)
    w_t = jnp.concatenate([w[:, :C].T * (1.0 / L), w[:, C:].T], axis=0)   # (2C, O)

    itemsize = x_k.dtype.itemsize
    row_bytes = CS * itemsize
    out_dtype = x_nchw.dtype

    vmem_cap = _vmem_capacity_bytes()
    if block_budget_bytes is None:
        # ~1/8 of physical VMEM per input block: 16 MiB on v5e/v6e (128 MiB),
        # 8 MiB on v7x (64 MiB).  Double buffering stays well under the cap.
        block_budget_bytes = int(min(16 << 20, max(2 << 20, vmem_cap // 8)))

    w_bytes = int(w_t.size) * 4
    cost = pl.CostEstimate(
        flops=3 * N * CS * L + 2 * N * (2 * C) * O * S,
        transcendentals=0,
        bytes_accessed=N * CS * L * itemsize + w_bytes + N * S * O * itemsize,
    )

    if L * row_bytes <= block_budget_bytes:
        # ---------------- batched path (small images) ----------------
        TN = max(1, min(N, block_budget_bytes // max(1, L * row_bytes)))
        G = pl.cdiv(N, TN)
        block_bytes = TN * CS * L * itemsize
        out_block_bytes = TN * S * O * itemsize
        vmem_limit = _vmem_limit_bytes(block_bytes, w_bytes, out_block_bytes,
                                       0, vmem_cap)

        kernel = functools.partial(_batched_kernel, n_channels=C, n_stripes=S,
                                   use_relu=use_relu)
        out_nso = pl.pallas_call(
            kernel,
            out_shape=jax.ShapeDtypeStruct((N, S, O), out_dtype),
            grid=(G,),
            in_specs=[
                pl.BlockSpec((TN, CS, L), lambda i: (i, 0, 0)),
                pl.BlockSpec((2 * C, O), lambda i: (0, 0)),
            ],
            out_specs=pl.BlockSpec((TN, S, O), lambda i: (i, 0, 0)),
            compiler_params=pltpu.CompilerParams(
                dimension_semantics=("parallel",),
                vmem_limit_bytes=vmem_limit,
            ),
            cost_estimate=cost,
        )(x_k, w_t)
    else:
        # ---------------- streaming path (large images) ----------------
        TL = max(128, (block_budget_bytes // row_bytes) // 128 * 128)
        K = pl.cdiv(L, TL)
        rem = L % TL                      # 0 => L divides evenly, no masking
        block_bytes = CS * TL * itemsize
        out_block_bytes = S * O * itemsize
        scratch_bytes = 2 * ((CS + 7) // 8) * 4096
        vmem_limit = _vmem_limit_bytes(block_bytes, w_bytes, out_block_bytes,
                                       scratch_bytes, vmem_cap)
        use_mxu = (2 * C) >= 16

        kernel = functools.partial(_stream_kernel, n_channels=C, n_stripes=S,
                                   rem=rem, use_relu=use_relu, use_mxu=use_mxu)
        # TODO(synk): on v7x (2 TCs) split C*S into two parallel groups with
        # partial conv outputs when N == 1 so both cores get work.
        out_nso = pl.pallas_call(
            kernel,
            out_shape=jax.ShapeDtypeStruct((N, S, O), out_dtype),
            grid=(N, K),
            in_specs=[
                pl.BlockSpec((1, CS, TL), lambda n, k: (n, 0, k)),
                pl.BlockSpec((2 * C, O), lambda n, k: (0, 0)),
            ],
            out_specs=pl.BlockSpec((1, S, O), lambda n, k: (n, 0, 0)),
            scratch_shapes=[
                pltpu.VMEM((CS, 1), jnp.float32),   # running sum
                pltpu.VMEM((CS, 1), jnp.float32),   # running max
            ],
            compiler_params=pltpu.CompilerParams(
                dimension_semantics=("parallel", "arbitrary"),
                vmem_limit_bytes=vmem_limit,
            ),
            cost_estimate=cost,
        )(x_k, w_t)

    # PyTorch output convention: (N, O, S, 1).  Tiny transpose in the wrapper.
    return jnp.transpose(out_nso, (0, 2, 1))[..., None]


# --------------------------------------------------------------------------
# Pure-JAX reference
# --------------------------------------------------------------------------
def _reference(x_nchw, conv_weight, *, num_stripes=1, use_relu=False):
    N, C, H, W = x_nchw.shape
    S = num_stripes
    xr = x_nchw.reshape(N, C, S, H // S, W)
    x_avg = jnp.mean(xr, axis=(3, 4))                  # (N, C, S)
    x_max = jnp.max(xr, axis=(3, 4))                   # (N, C, S)
    cat = jnp.concatenate([x_avg, x_max], axis=1)      # (N, 2C, S)
    wmat = conv_weight[:, :, 0, 0]                     # (O, 2C)
    out = jnp.einsum("ncs,oc->nos", cat, wmat,
                     precision=jax.lax.Precision.HIGHEST)
    if use_relu:
        out = jnp.maximum(out, 0.0)
    return out[..., None]


if __name__ == "__main__":
    key = jax.random.PRNGKey(0)
    k1, k2, k3, k4, k5, k6, k7, k8 = jax.random.split(key, 8)

    # Config A: tiny channels, small image -> batched (N-tiled) path, S=1.
    x = jax.random.normal(k1, (2, 4, 16, 16), dtype=jnp.float32)
    cw = jax.random.normal(k2, (4, 8, 1, 1), dtype=jnp.float32) * 0.1
    out = jax.block_until_ready(max_avg_plus(x, cw, num_stripes=1, use_relu=False))
    ref = _reference(x, cw, num_stripes=1, use_relu=False)
    assert out.shape == (2, 4, 1, 1), out.shape
    assert jnp.allclose(out, ref, atol=1e-4, rtol=1e-4), "config A mismatch"

    # Config B: larger channels, small image -> batched path, S=2, ReLU.
    x2 = jax.random.normal(k3, (2, 128, 16, 16), dtype=jnp.float32)
    cw2 = jax.random.normal(k4, (64, 256, 1, 1), dtype=jnp.float32) * 0.05
    out2 = jax.block_until_ready(max_avg_plus(x2, cw2, num_stripes=2, use_relu=True))
    ref2 = _reference(x2, cw2, num_stripes=2, use_relu=True)
    assert out2.shape == (2, 64, 2, 1), out2.shape
    assert jnp.allclose(out2, ref2, atol=1e-2, rtol=1e-2), "config B mismatch"

    # Config C: streaming path, ragged L (10000 % 128 != 0), tiny C (VPU
    # finalize), S=1; small explicit block budget forces K > 1 tiles.
    x3 = jax.random.normal(k5, (2, 4, 100, 100), dtype=jnp.float32)
    cw3 = jax.random.normal(k6, (8, 8, 1, 1), dtype=jnp.float32) * 0.1
    out3 = jax.block_until_ready(
        max_avg_plus(x3, cw3, num_stripes=1, use_relu=False,
                     block_budget_bytes=64 * 1024))
    ref3 = _reference(x3, cw3, num_stripes=1, use_relu=False)
    assert out3.shape == (2, 8, 1, 1), out3.shape
    assert jnp.allclose(out3, ref3, atol=1e-3, rtol=1e-3), "config C mismatch"

    # Config D: streaming path, ragged L, MXU finalize, S=2, ReLU.
    x4 = jax.random.normal(k7, (1, 32, 96, 100), dtype=jnp.float32)
    cw4 = jax.random.normal(k8, (48, 64, 1, 1), dtype=jnp.float32) * 0.05
    out4 = jax.block_until_ready(
        max_avg_plus(x4, cw4, num_stripes=2, use_relu=True,
                     block_budget_bytes=512 * 1024))
    ref4 = _reference(x4, cw4, num_stripes=2, use_relu=True)
    assert out4.shape == (1, 48, 2, 1), out4.shape
    assert jnp.allclose(out4, ref4, atol=2e-2, rtol=2e-2), "config D mismatch"

    print("KERNEL_OK")
</pallas_src>

<mosaic_0001>
module attributes {stable_mosaic.version = 11 : i64} {
  func.func @_batched_kernel(%arg0: i32, %arg1: memref<2x4x256xf32, #tpu.memory_space<vmem>>, %arg2: memref<8x4xf32, #tpu.memory_space<vmem>>, %arg3: memref<2x1x4xf32, #tpu.memory_space<vmem>>) attributes {dimension_semantics = [#tpu.dimension_semantics<parallel>], iteration_bounds = array<i64: 1>, scalar_prefetch = 0 : i64, scratch_operands = 0 : i64, tpu.core_type = #tpu.core_type<tc>, window_params = [{transform_indices = @transform_0, window_bounds = array<i64: 2, 4, 256>}, {pipeline_mode = #tpu.pipeline_mode<synchronous>, transform_indices = @transform_1, window_bounds = array<i64: 8, 4>}, {transform_indices = @transform_2, window_bounds = array<i64: 2, 1, 4>}]} {
    %c0 = arith.constant 0 : index
    %c0_0 = arith.constant 0 : index
    %c0_1 = arith.constant 0 : index
    %0 = vector.load %arg1[%c0, %c0_0, %c0_1] : memref<2x4x256xf32, #tpu.memory_space<vmem>>, vector<2x4x256xf32>
    %cst = arith.constant dense<0.000000e+00> : vector<2x4xf32>
    %1 = vector.multi_reduction <add>, %0, %cst [2] : vector<2x4x256xf32> to vector<2x4xf32>
    %cst_2 = arith.constant dense<0xFF800000> : vector<2x4xf32>
    %2 = vector.multi_reduction <maximumf>, %0, %cst_2 [2] : vector<2x4x256xf32> to vector<2x4xf32>
    %c0_3 = arith.constant 0 : index
    %c0_4 = arith.constant 0 : index
    %3 = vector.load %arg2[%c0_3, %c0_4] : memref<8x4xf32, #tpu.memory_space<vmem>>, vector<8x4xf32>
    %4 = tpu.concatenate %1, %2 in 1 : vector<2x4xf32>, vector<2x4xf32> -> vector<2x8xf32>
    %cst_5 = arith.constant dense<0.000000e+00> : vector<2x4xf32>
    %5 = tpu.matmul %4, %3, %cst_5 {dimension_numbers = #tpu.dot_dimension_numbers<[1], [0], [0], [1], [0, 0, 1, 1], [], []>} : vector<2x8xf32>, vector<8x4xf32>, vector<2x4xf32> -> vector<2x4xf32>
    %6 = vector.shape_cast %5 : vector<2x4xf32> to vector<2x1x4xf32>
    %c0_6 = arith.constant 0 : index
    %c0_7 = arith.constant 0 : index
    %c0_8 = arith.constant 0 : index
    %7 = vector.load %arg3[%c0_6, %c0_7, %c0_8] : memref<2x1x4xf32, #tpu.memory_space<vmem>>, vector<2x1x4xf32>
    tpu.vector_store %arg3[%c0_6, %c0_7, %c0_8], %6 {strides = array<i32>} : memref<2x1x4xf32, #tpu.memory_space<vmem>>, vector<2x1x4xf32>,
    return
  }
  func.func @transform_0(%arg0: i32) -> (i32, i32, i32) {
    %c0_i32 = arith.constant 0 : i32
    %c0_i32_0 = arith.constant 0 : i32
    %c0_i32_1 = arith.constant 0 : i32
    return %arg0, %c0_i32, %c0_i32_0 : i32, i32, i32
  }
  func.func @transform_1(%arg0: i32) -> (i32, i32) {
    %c0_i32 = arith.constant 0 : i32
    %c0_i32_0 = arith.constant 0 : i32
    %c0_i32_1 = arith.constant 0 : i32
    return %c0_i32, %c0_i32_0 : i32, i32
  }
  func.func @transform_2(%arg0: i32) -> (i32, i32, i32) {
    %c0_i32 = arith.constant 0 : i32
    %c0_i32_0 = arith.constant 0 : i32
    %c0_i32_1 = arith.constant 0 : i32
    return %arg0, %c0_i32, %c0_i32_0 : i32, i32, i32
  }
}

</mosaic_0001>

<bundles_post_ra>
// kernel: tpu_custom_call.1
= control target key start
LH: loop header
LB: loop body
LE: loop exit
PB: predicated region body
PF: predicated region fallthrough
CT: control target
= control target key end

     0   :  { %7 = vsyncpa [#allocation3], 0  ;;  %s301_s0 = inlined_call_operand.hbm [shape: f32[2,4,256], index: 0, kind: input, shape index: {}]   ;;  %s302_s1 = inlined_call_operand.vmem [shape: f32[8,4], index: 1, kind: input, shape index: {}]   ;;  %s303_s2 = inlined_call_operand.hbm [shape: f32[2,1,4], index: 2, kind: output, shape index: {}]  }
   0x1   :  { %8 = vsyncpa [#allocation4], 0  ;;  %s268_s9 = smov [#allocation2]  }
   0x2   :  { %s14_s10 = sshll.u32 %s268_s9, 4  ;;  %s15_s10 = int_to_ptr.vmem [resolvable:$true] %s14_s10 }
   0x3   :  { %s232_s11 = scalar_lea.vmem %s15_s10, 256  ;;  %p237_p1 = scmp.lt.s32.totalorder %s15_s10, %s15_s10 }
   0x4   :  { %p233_p0 = scmp.ne.s32.totalorder %s15_s10, %s232_s11  ;;  %p238_p2 = scmp.lt.s32.totalorder %s232_s11, %s232_s11 }
   0x6   :  { %p239_p3 = por %p238_p2, %p237_p1 }
   0x8   :  { %p240_p4 = pnand %p239_p3, %p233_p0 }
   0xa   :  { %243 = shalt.err (!%p240_p4)
}
   0xb   :  { %s269_s12 = smov 128   ;;  %s270_s13 = smov 8  }
   0xc   :  { %20 = dma.hbm_to_vmem [thread:$0]  %s301_s0, 256, %s15_s10, [#allocation3], %s269_s12, %s269_s12, %s270_s13  }
   0xd   :  { %264 = dma.done.wait [#allocation3], 256  }
   0xe   :  { %265 = vsyncadd [#allocation3], 4294967040  ;;  %vm34_vm0 = vcmask 1043456   ;;  %v26_v0 = vld [vmem:[#allocation2] sm:$0xff]  ;;  %v27_v1 = vld [vmem:[#allocation2 + $0x8] sm:$0xff]  ;;  %v271_v16 = vmov 0.0   ;;  %v58_v18 = vlaneseq }
   0xf   :  { %v30_v2 = vcombine.high %v26_v0, %v26_v0  ;;  %v45_v3 = vsel %vm34_vm0, %v26_v0, -inf  ;;  %v35_v4 = vsel %vm34_vm0, %v26_v0, 0.0  ;;  %v31_v5 = vcombine.high %v27_v1, %v27_v1  ;;  %208 = vmatprep.subr.mxu0 %v271_v16  ;;  %v55_v17 = vld [vmem:[%s302_s1] sm:$0xff]  ;;  %s274_s1 = smov [#allocation5]  }
  0x10   :  { %v50_v6 = vsel %vm34_vm0, %v27_v1, -inf  ;;  %v40_v7 = vsel %vm34_vm0, %v27_v1, 0.0  ;;  %209 = vmatpush3.msra.mxu0 %v55_v17  ;;  %vm272_vm1 = vmmov 0   ;;  %v59_v19 = vand.u32 127, %v58_v18  ;;  %s193_s17 = sshll.u32 %s274_s1, 4  ;;  %s194_s17 = int_to_ptr.vmem [resolvable:$true] %s193_s17 }
  0x11   :  { %v46_v8 = vsel %vm34_vm0, %v30_v2, -inf  ;;  %v36_v9 = vsel %vm34_vm0, %v30_v2, 0.0  ;;  %v51_v10 = vsel %vm34_vm0, %v31_v5, -inf  ;;  %v41_v11 = vsel %vm34_vm0, %v31_v5, 0.0  ;;  %210 = vmatprep.mubr.msk.f32.mxu0 %vm272_vm1, %v271_v16  ;;  %s244_s18 = scalar_lea.vmem %s194_s17, 32  ;;  %p249_p6 = scmp.lt.s32.totalorder %s194_s17, %s194_s17 }
  0x12   :  { %v47_v12 = vmax.f32 %v45_v3, %v46_v8  ;;  %v37_v13 = vadd.f32 %v36_v9, %v35_v4  ;;  %v52_v14 = vmax.f32 %v50_v6, %v51_v10  ;;  %v42_v15 = vadd.f32 %v41_v11, %v40_v7  ;;  %p245_p5 = scmp.ne.s32.totalorder %s194_s17, %s244_s18  ;;  %p250_p7 = scmp.lt.s32.totalorder %s244_s18, %s244_s18 }
  0x13   :  { %v61_v20 = vshrl.u32 %v58_v18, 7  ;;  %v73_v21 = vadd.s32 4294967292, %v59_v19  ;;  %vm68_vm2 = vcmask 1041409   ;;  %vm84_vm3 = vcmask 31744  }
  0x14   :  { %48 = vmax.xlane.f32.xlu1 %v47_v12  ;;  %38 = vadd.xlane.f32.xlu0 %v37_v13  ;;  %vm86_vm4 = vcmask 64512   ;;  %v273_v35 = vmov 1966171168   ;;  %vm185_vm5 = vcmask 24576   ;;  %p251_p8 = por %p250_p7, %p249_p6 }
  0x15   :  { %v76_v24 = vsub.s32 %v73_v21, %v61_v20  ;;  %v62_v25 = vsub.s32 %v59_v19, %v61_v20  ;;  %v162_v36 = vunpack.c.l.s4 %v273_v35 }
  0x16   :  { %p252_p9 = pnand %p251_p8, %p245_p5 }
  0x17   :  { %v163_v37 = vunpack.c.0.s8 %v162_v36 }
  0x18   :  { %53 = vmax.xlane.f32.xlu1 %v52_v14  ;;  %43 = vadd.xlane.f32.xlu0 %v42_v15 }
  0x19   :  { %v166_v38 = vsub.s32 %v163_v37, %v61_v20 }
  0x9d   :  { %v49_v22 = vpop.xlane.xlu1 %48  ;;  %v39_v23 = vpop.xlane.xlu0 %38 }
  0x9e   :  { %v77_v28 = vrot.slane %v49_v22, %v76_v24  ;;  %v63_v29 = vrot.slane %v39_v23, %v62_v25 }
  0xa1   :  { %v54_v26 = vpop.xlane.xlu1 %53  ;;  %v44_v27 = vpop.xlane.xlu0 %43 }
  0xa2   :  { %v81_v30 = vrot.slane %v54_v26, %v76_v24  ;;  %v67_v31 = vrot.slane %v44_v27, %v62_v25 }
  0xa4   :  { %v82_v32 = vsel %vm68_vm2, %v81_v30, %v77_v28  ;;  %v69_v33 = vsel %vm68_vm2, %v67_v31, %v63_v29 }
  0xa5   :  { %v85_v34 = vsel %vm84_vm3, %v69_v33, %v82_v32 }
  0xa6   :  { %211 = vmatmul.mubr.msk.f32.vlgmr.msra.gmra.mxu0 %vm86_vm4, %v85_v34 }
 0x166   :  { %v156_v39 = vpop.f32.mrf.mxu0 }
 0x167   :  { %v167_v40 = vrot.slane %v156_v39, %v166_v38 }
 0x168   :  { %v212_v41 = vpop.f32.mrf.mxu0 }
 0x169   :  { %v168_v42 = vcombine.high %v167_v40, %v167_v40  ;;  %v175_v43 = vrot.slane %v167_v40, %v166_v38 }
 0x16b   :  { %v182_v44 = vrot.slane %v168_v42, %v166_v38  ;;  %186 = vst.msk [vmem:[#allocation5] sm:$0x1] %vm185_vm5, %v175_v43 }
 0x16d   :  { %187 = vst.msk [vmem:[#allocation5 + $0x1] sm:$0x1] %vm185_vm5, %v182_v44 }
 0x16e   :  { %255 = shalt.err (!%p252_p9)
}
 0x16f   :  { %s275_s19 = smov 16   ;;  %s276_s20 = smov 1  }
 0x170   :  { %199 = dma.vmem_to_hbm [thread:$0]  %s194_s17, 32, %s303_s2, [#allocation4], %s275_s19, %s275_s19, %s276_s20  }
 0x171   :  { %266 = dma.done.wait [#allocation4], 32  }
 0x172   :  { %267 = vsyncadd [#allocation4], 4294967264 }
 0x173   :  { %203 = vsyncpa [#allocation3], 1 }
 0x174   :  { %204 = vsyncpa [#allocation4], 1 }

</bundles_post_ra>
